<compile_context>
chip_gen: v7x
topology: tpu7x:2x2x1
jax: 0.10.0
libtpu: 0.0.40
codegen_flags: <defaults>
</compile_context>

<pallas_src>
import math

import jax
import jax.numpy as jnp
from jax.experimental import pallas as pl
from jax.experimental.pallas import tpu as pltpu


def _round_up(a, b):
    return (a + b - 1) // b * b


def _tpu_defaults():
    """Generation-aware defaults: VMEM cap, dual-TC hint, default tile sizes."""
    kind = ""
    try:
        kind = (getattr(jax.devices()[0], "device_kind", "") or "").lower()
    except Exception:
        pass
    if "v7" in kind:
        # 64 MiB VMEM per TensorCore, 2 TCs per chip.
        return dict(vmem_cap=52 << 20, two_cores=True, ffn_block=1024, token_block=512)
    if any(t in kind for t in ("v4", "v5", "v6")):
        # 128 MiB physical VMEM, single TC.
        return dict(vmem_cap=100 << 20, two_cores=False, ffn_block=2048, token_block=512)
    # Unknown / older generation: be conservative.
    return dict(vmem_cap=48 << 20, two_cores=False, ffn_block=1024, token_block=256)


def _valid_ffn_tiles(F):
    """Divisors of F that are multiples of 128 (lane-aligned), plus F itself."""
    tiles = {F}
    d = 128
    while d < F:
        if F % d == 0:
            tiles.add(d)
        d += 128
    return sorted(tiles)


def _mlp_kernel_scratch(x_ref, w1_ref, b1_ref, w2_ref, o_ref, acc_ref):
    """Fused dense_h_to_4h -> bias_gelu -> dense_4h_to_h; narrow output dtype path.

    x_ref  : VMEM (TM, H)   token tile (native dtype)
    w1_ref : VMEM (H, TF)   dense_h_to_4h weight tile (pre-transposed, native dtype)
    b1_ref : VMEM (1, TF)   dense_h_to_4h bias tile
    w2_ref : VMEM (TF, H)   dense_4h_to_h weight tile (pre-transposed, native dtype)
    o_ref  : VMEM (TM, H)   output tile (written on last ffn step)
    acc_ref: VMEM (TM, H)   f32 accumulator over the ffn axis
    """
    f = pl.program_id(1)

    @pl.when(f == 0)
    def _():
        acc_ref[...] = jnp.zeros_like(acc_ref)

    # First projection for this TF slice; MXU runs in the native input dtype,
    # accumulation in f32.
    h = jnp.dot(x_ref[...], w1_ref[...], preferred_element_type=jnp.float32)
    h = h + b1_ref[...].astype(jnp.float32)
    # Megatron fused bias_gelu (tanh approximation) in f32 — elementwise along TF,
    # so tiling the ffn axis is exact.
    g = h * 0.5 * (1.0 + jnp.tanh(0.79788456 * h * (1.0 + 0.044715 * h * h)))
    # Partial second projection: cast GELU result to the weight dtype (native MXU path),
    # accumulate in f32.
    acc_ref[...] += jnp.dot(g.astype(w2_ref.dtype), w2_ref[...],
                            preferred_element_type=jnp.float32)

    @pl.when(f == pl.num_programs(1) - 1)
    def _():
        o_ref[...] = acc_ref[...].astype(o_ref.dtype)


def _mlp_kernel_accout(x_ref, w1_ref, b1_ref, w2_ref, o_ref):
    """Same as above, but f32 output: accumulate directly into the resident output
    tile (its block index is constant over the ffn axis), saving the f32 scratch."""
    f = pl.program_id(1)

    @pl.when(f == 0)
    def _():
        o_ref[...] = jnp.zeros_like(o_ref)

    h = jnp.dot(x_ref[...], w1_ref[...], preferred_element_type=jnp.float32)
    h = h + b1_ref[...].astype(jnp.float32)
    g = h * 0.5 * (1.0 + jnp.tanh(0.79788456 * h * (1.0 + 0.044715 * h * h)))
    o_ref[...] += jnp.dot(g.astype(w2_ref.dtype), w2_ref[...],
                          preferred_element_type=jnp.float32)


def parallel_mlp(hidden_states, w1, b1, w2, b2, *, token_block=None, ffn_block=None):
    """ParallelMLP forward (world_size=1, bias_gelu_fusion=True).

    hidden_states : (B, S, H)
    w1 : (F, H)  dense_h_to_4h.weight      b1 : (F,)  dense_h_to_4h.bias
    w2 : (H, F)  dense_4h_to_h.weight      b2 : (H,)  dense_4h_to_h.bias
    Returns (output, output_bias) where output_bias == b2 (skip_bias_add=True).
    """
    B, S, H = hidden_states.shape
    F, H1 = w1.shape
    assert H1 == H and w2.shape == (H, F) and b1.shape == (F,) and b2.shape == (H,)

    cfg = _tpu_defaults()
    if token_block is None:
        token_block = cfg["token_block"]
    if ffn_block is None:
        ffn_block = cfg["ffn_block"]
    vmem_cap = cfg["vmem_cap"]
    two_cores = cfg["two_cores"]

    N = B * S
    x = hidden_states.reshape(N, H)

    out_dtype = hidden_states.dtype
    x_item = jnp.dtype(x.dtype).itemsize
    w_item = jnp.dtype(w1.dtype).itemsize
    out_item = jnp.dtype(out_dtype).itemsize
    acc_in_output = (out_dtype == jnp.float32)
    use_scratch = not acc_in_output

    # --- Token tiling: big blocks amortize weight streaming; multiple of 8 sublanes. ---
    TM = max(8, (min(token_block, _round_up(N, 8)) // 8) * 8)
    # On dual-TC chips make sure the "parallel" token axis has >= 2 blocks.
    if two_cores and N > 8 and _round_up(N, TM) // TM < 2:
        TM = max(8, _round_up((N + 1) // 2, 8))

    # --- ffn tiling: lane-aligned divisor of F (reduction axis of the 2nd matmul). ---
    cands = _valid_ffn_tiles(F)
    fits = [c for c in cands if c <= ffn_block]
    TF = max(fits) if fits else min(cands)

    # --- VMEM fitting: shrink TF (weight tiles dominate), then TM, until it fits. ---
    def est(tm, tf):
        e = 2 * tm * H * x_item          # x tile, double-buffered
        e += 2 * H * tf * w_item         # w1^T tile
        e += 2 * 8 * tf * w_item         # b1 tile (sublane-padded)
        e += 2 * tf * H * w_item         # w2^T tile
        e += 2 * tm * H * out_item       # output tile
        if use_scratch:
            e += tm * H * 4              # f32 accumulator scratch
        return e

    budget = int(0.85 * vmem_cap)
    while est(TM, TF) > budget:
        smaller = [c for c in cands if c < TF]
        if smaller:
            TF = max(smaller)
        elif TM > 8:
            TM = max(8, (TM // 2) // 8 * 8)
        else:
            break

    Npad = _round_up(N, TM)
    if Npad != N:
        x = jnp.pad(x, ((0, Npad - N), (0, 0)))

    w1_t = w1.T                # (H, F)  -> x @ w1_t == F.linear(x, w1)
    w2_t = w2.T                # (F, H)
    b1_r = b1.reshape(1, F)

    vmem_limit = int(min(vmem_cap, max(int(1.25 * est(TM, TF)) + (2 << 20), 16 << 20)))

    kernel = _mlp_kernel_accout if acc_in_output else _mlp_kernel_scratch
    scratch_shapes = [] if acc_in_output else [pltpu.VMEM((TM, H), jnp.float32)]

    out = pl.pallas_call(
        kernel,
        out_shape=jax.ShapeDtypeStruct((Npad, H), out_dtype),
        grid_spec=pltpu.PrefetchScalarGridSpec(
            num_scalar_prefetch=0,
            grid=(Npad // TM, F // TF),           # reduction (ffn) axis last
            in_specs=[
                pl.BlockSpec((TM, H), lambda i, f: (i, 0)),   # x tile
                pl.BlockSpec((H, TF), lambda i, f: (0, f)),   # w1^T tile
                pl.BlockSpec((1, TF), lambda i, f: (0, f)),   # b1 tile
                pl.BlockSpec((TF, H), lambda i, f: (f, 0)),   # w2^T tile
            ],
            out_specs=pl.BlockSpec((TM, H), lambda i, f: (i, 0)),
            scratch_shapes=scratch_shapes,
        ),
        compiler_params=pltpu.CompilerParams(
            dimension_semantics=("parallel", "arbitrary"),
            vmem_limit_bytes=vmem_limit,
        ),
    )(x, w1_t, b1_r, w2_t)

    out = out[:N].reshape(B, S, H)
    # RowParallelLinear(skip_bias_add=True): bias is returned, not applied.
    return out, b2


def _reference(x, w1, b1, w2, b2):
    y = jnp.einsum("bsh,fh->bsf", x, w1)                     # F.linear, no bias
    h = y + b1
    g = h * 0.5 * (1.0 + jnp.tanh(0.79788456 * h * (1.0 + 0.044715 * h * h)))
    out = jnp.einsum("bsf,hf->bsh", g, w2)                   # F.linear, no bias
    return out, b2


if __name__ == "__main__":
    # Small shapes implied by the module: batch=2, seq=8, hidden=128, ffn=4*hidden.
    B, S, H = 2, 8, 128
    F = 4 * H

    key = jax.random.PRNGKey(0)
    kx, k1, k2, kb1, kb2 = jax.random.split(key, 5)

    # xavier_normal_ on the weights (gain=1): std = sqrt(2 / (fan_in + fan_out)).
    std1 = math.sqrt(2.0 / (F + H))
    std2 = math.sqrt(2.0 / (H + F))
    w1 = jax.random.normal(k1, (F, H), jnp.float32) * std1   # dense_h_to_4h.weight
    w2 = jax.random.normal(k2, (H, F), jnp.float32) * std2   # dense_4h_to_h.weight
    # Module zero-inits the biases; use small random values so the fused
    # bias-GELU path is actually exercised numerically.
    b1 = jax.random.normal(kb1, (F,), jnp.float32) * 0.02
    b2 = jax.random.normal(kb2, (H,), jnp.float32) * 0.02

    x = jax.random.normal(kx, (B, S, H), jnp.float32)

    # f32 path (accumulates directly into the resident output tile).
    # ffn_block=256 so the demo exercises the reduction/accumulator path (2 ffn steps).
    out, out_bias = parallel_mlp(x, w1, b1, w2, b2, token_block=256, ffn_block=256)
    jax.block_until_ready(out)
    ref_out, ref_bias = _reference(x, w1, b1, w2, b2)
    assert out.shape == (B, S, H)
    assert jnp.allclose(out, ref_out, atol=1e-4, rtol=1e-4)
    assert jnp.allclose(out_bias, ref_bias)

    # bf16 path (native bf16 MXU matmuls, f32 scratch accumulator, bf16 output).
    xb, w1b, b1b, w2b, b2b = (a.astype(jnp.bfloat16) for a in (x, w1, b1, w2, b2))
    out_b, out_bias_b = parallel_mlp(xb, w1b, b1b, w2b, b2b,
                                     token_block=256, ffn_block=256)
    jax.block_until_ready(out_b)
    ref_out_b, _ = _reference(xb.astype(jnp.float32), w1b.astype(jnp.float32),
                              b1b.astype(jnp.float32), w2b.astype(jnp.float32), b2b)
    assert out_b.dtype == jnp.bfloat16
    assert jnp.allclose(out_b.astype(jnp.float32), ref_out_b, atol=5e-2, rtol=5e-2)
    assert jnp.allclose(out_bias_b.astype(jnp.float32), b2b.astype(jnp.float32))

    print("KERNEL_OK")
</pallas_src>

<mosaic_0001>
module attributes {stable_mosaic.version = 11 : i64} {
  func.func @_mlp_kernel_accout(%arg0: i32, %arg1: i32, %arg2: memref<16x128xf32, #tpu.memory_space<vmem>>, %arg3: memref<128x256xf32, #tpu.memory_space<vmem>>, %arg4: memref<1x256xf32, #tpu.memory_space<vmem>>, %arg5: memref<256x128xf32, #tpu.memory_space<vmem>>, %arg6: memref<16x128xf32, #tpu.memory_space<vmem>>) attributes {dimension_semantics = [#tpu.dimension_semantics<parallel>, #tpu.dimension_semantics<arbitrary>], iteration_bounds = array<i64: 1, 2>, scalar_prefetch = 0 : i64, scratch_operands = 0 : i64, tpu.core_type = #tpu.core_type<tc>, window_params = [{transform_indices = @transform_0, window_bounds = array<i64: 16, 128>}, {transform_indices = @transform_1, window_bounds = array<i64: 128, 256>}, {transform_indices = @transform_2, window_bounds = array<i64: 1, 256>}, {transform_indices = @transform_3, window_bounds = array<i64: 256, 128>}, {transform_indices = @transform_4, window_bounds = array<i64: 16, 128>}]} {
    %c0_i32 = arith.constant 0 : i32
    %0 = arith.cmpi eq, %arg1, %c0_i32 : i32
    %1 = arith.extui %0 : i1 to i32
    %c0_i32_0 = arith.constant 0 : i32
    %2 = arith.cmpi ne, %1, %c0_i32_0 : i32
    scf.if %2 {
      %cst_18 = arith.constant 0.000000e+00 : f32
      %28 = vector.broadcast %cst_18 : f32 to vector<16x128xf32>
      %c0_19 = arith.constant 0 : index
      %c0_20 = arith.constant 0 : index
      %29 = vector.load %arg6[%c0_19, %c0_20] : memref<16x128xf32, #tpu.memory_space<vmem>>, vector<16x128xf32>
      tpu.vector_store %arg6[%c0_19, %c0_20], %28 {strides = array<i32>} : memref<16x128xf32, #tpu.memory_space<vmem>>, vector<16x128xf32>,
    } else {
    }
    %c0 = arith.constant 0 : index
    %c0_1 = arith.constant 0 : index
    %3 = vector.load %arg2[%c0, %c0_1] : memref<16x128xf32, #tpu.memory_space<vmem>>, vector<16x128xf32>
    %c0_2 = arith.constant 0 : index
    %c0_3 = arith.constant 0 : index
    %4 = vector.load %arg3[%c0_2, %c0_3] : memref<128x256xf32, #tpu.memory_space<vmem>>, vector<128x256xf32>
    %cst = arith.constant dense<0.000000e+00> : vector<16x256xf32>
    %5 = tpu.matmul %3, %4, %cst {dimension_numbers = #tpu.dot_dimension_numbers<[1], [0], [0], [1], [0, 0, 1, 1], [], []>} : vector<16x128xf32>, vector<128x256xf32>, vector<16x256xf32> -> vector<16x256xf32>
    %c0_4 = arith.constant 0 : index
    %c0_5 = arith.constant 0 : index
    %6 = vector.load %arg4[%c0_4, %c0_5] : memref<1x256xf32, #tpu.memory_space<vmem>>, vector<1x256xf32>
    %7 = vector.broadcast %6 : vector<1x256xf32> to vector<16x256xf32>
    %8 = arith.addf %5, %7 : vector<16x256xf32>
    %cst_6 = arith.constant 5.000000e-01 : f32
    %9 = vector.broadcast %cst_6 : f32 to vector<16x256xf32>
    %10 = arith.mulf %8, %9 : vector<16x256xf32>
    %cst_7 = arith.constant 0.797884583 : f32
    %11 = vector.broadcast %cst_7 : f32 to vector<16x256xf32>
    %12 = arith.mulf %11, %8 : vector<16x256xf32>
    %cst_8 = arith.constant 4.471500e-02 : f32
    %13 = vector.broadcast %cst_8 : f32 to vector<16x256xf32>
    %14 = arith.mulf %13, %8 : vector<16x256xf32>
    %15 = arith.mulf %14, %8 : vector<16x256xf32>
    %cst_9 = arith.constant 1.000000e+00 : f32
    %16 = vector.broadcast %cst_9 : f32 to vector<16x256xf32>
    %17 = arith.addf %16, %15 : vector<16x256xf32>
    %18 = arith.mulf %12, %17 : vector<16x256xf32>
    %19 = math.tanh %18 : vector<16x256xf32>
    %cst_10 = arith.constant 1.000000e+00 : f32
    %20 = vector.broadcast %cst_10 : f32 to vector<16x256xf32>
    %21 = arith.addf %20, %19 : vector<16x256xf32>
    %22 = arith.mulf %10, %21 : vector<16x256xf32>
    %c0_11 = arith.constant 0 : index
    %c0_12 = arith.constant 0 : index
    %23 = vector.load %arg6[%c0_11, %c0_12] : memref<16x128xf32, #tpu.memory_space<vmem>>, vector<16x128xf32>
    %c0_13 = arith.constant 0 : index
    %c0_14 = arith.constant 0 : index
    %24 = vector.load %arg5[%c0_13, %c0_14] : memref<256x128xf32, #tpu.memory_space<vmem>>, vector<256x128xf32>
    %cst_15 = arith.constant dense<0.000000e+00> : vector<16x128xf32>
    %25 = tpu.matmul %22, %24, %cst_15 {dimension_numbers = #tpu.dot_dimension_numbers<[1], [0], [0], [1], [0, 0, 1, 1], [], []>} : vector<16x256xf32>, vector<256x128xf32>, vector<16x128xf32> -> vector<16x128xf32>
    %26 = arith.addf %23, %25 : vector<16x128xf32>
    %c0_16 = arith.constant 0 : index
    %c0_17 = arith.constant 0 : index
    %27 = vector.load %arg6[%c0_16, %c0_17] : memref<16x128xf32, #tpu.memory_space<vmem>>, vector<16x128xf32>
    tpu.vector_store %arg6[%c0_16, %c0_17], %26 {strides = array<i32>} : memref<16x128xf32, #tpu.memory_space<vmem>>, vector<16x128xf32>,
    return
  }
  func.func @transform_0(%arg0: i32, %arg1: i32) -> (i32, i32) {
    %c0_i32 = arith.constant 0 : i32
    %c0_i32_0 = arith.constant 0 : i32
    return %arg0, %c0_i32 : i32, i32
  }
  func.func @transform_1(%arg0: i32, %arg1: i32) -> (i32, i32) {
    %c0_i32 = arith.constant 0 : i32
    %c0_i32_0 = arith.constant 0 : i32
    return %c0_i32, %arg1 : i32, i32
  }
  func.func @transform_2(%arg0: i32, %arg1: i32) -> (i32, i32) {
    %c0_i32 = arith.constant 0 : i32
    %c0_i32_0 = arith.constant 0 : i32
    return %c0_i32, %arg1 : i32, i32
  }
  func.func @transform_3(%arg0: i32, %arg1: i32) -> (i32, i32) {
    %c0_i32 = arith.constant 0 : i32
    %c0_i32_0 = arith.constant 0 : i32
    return %arg1, %c0_i32 : i32, i32
  }
  func.func @transform_4(%arg0: i32, %arg1: i32) -> (i32, i32) {
    %c0_i32 = arith.constant 0 : i32
    %c0_i32_0 = arith.constant 0 : i32
    return %arg0, %c0_i32 : i32, i32
  }
}

</mosaic_0001>

<bundles_post_ra>
// kernel: tpu_custom_call.1
= control target key start
LH: loop header
LB: loop body
LE: loop exit
PB: predicated region body
PF: predicated region fallthrough
CT: control target
= control target key end

     0   :  { %9 = vsyncpa [#allocation3], 0  ;;  %s1441_s0 = inlined_call_operand.hbm [shape: f32[16,128], index: 0, kind: input, shape index: {}]   ;;  %s1442_s1 = inlined_call_operand.hbm [shape: f32[128,512], index: 1, kind: input, shape index: {}]   ;;  %s1443_s2 = inlined_call_operand.vmem [shape: f32[1,512], index: 2, kind: input, shape index: {}]   ;;  %s1444_s3 = inlined_call_operand.hbm [shape: f32[512,128], index: 3, kind: input, shape index: {}]   ;;  %s1445_s4 = inlined_call_operand.hbm [shape: f32[16,128], index: 4, kind: output, shape index: {}]  }
   0x1   :  { %10 = vsyncpa [#allocation6], 0 }
   0x2   :  { %12 = vsyncpa [#allocation6 + $0x1], 0 }
   0x3   :  { %13 = vsyncpa [#allocation4], 0  ;;  %s1129_s15 = smov 0   ;;  %s1131_s16 = smov 0  }
   0x4   :  { %s1133_s17 = smov 0   ;;  %s1135_s18 = smov 0  }
   0x5   :  { %s1137_s19 = smov 0   ;;  %s1139_s20 = smov 0  }
   0x6 LB: > { %s28_s21 = sadd.s32 1, %s1085_s19  ;;  %s64_s22 = sadd.s32 1, %s1077_s17  ;;  %s1089_s20 = sphi %s1139_s20, %s19_s20   ;;  %s1085_s19 = sphi %s1137_s19, %s1467_s19   ;;  %s1081_s18 = sphi %s1135_s18, %s1466_s18   ;;  %s1077_s17 = sphi %s1133_s17, %s1465_s17   ;;  %s1073_s16 = sphi %s1131_s16, %s1464_s16   ;;  %s1069_s15 = sphi %s1129_s15, %s1463_s15  }
   0x7   : > { %p29_p0 = scmp.ge.s32.totalorder %s28_s21, 2  ;;  %p71_p1 = scmp.ne.s32.totalorder %s1077_s17, %s1073_s16 }
   0x8   : > { %p72_p2 = scmp.eq.s32.totalorder %s1089_s20, 0  ;;  %p846_p4 = scmp.lt.s32.totalorder %s1089_s20, 2 }
   0x9   : > { %s1469_s21 = smov (%p29_p0, %s28_s21), 0  ;;  %s195_s24 = sand.u32 1, %s1089_s20  }
   0xa   : > { %p73_p3 = por %p72_p2, %p71_p1  ;;  %s61_s23 = ssub.s32 %s1085_s19, %s1469_s21 }
   0xb   : > { %p62_p5 = scmp.eq.s32.totalorder %s61_s23, 0  ;;  %s197_s25 = sand.u32 1, %s1077_s17  }
   0xc   : > { %s718_s26 = sshll.u32 %s1085_s19, 8  ;;  %s1175_s28 = sshll.u32 %s197_s25, 8 }
   0xd   : > { %s1173_s27 = scalar_select %p62_p5, %s1077_s17, %s64_s22  }
   0xe   : > { %s1180_s5 = scalar_lea.hbm %s1442_s1, %s718_s26  ;;  %p1182_p6 = pnand %p846_p4, %p73_p3 }
   0xf   : > { %s199_s7 = scalar_lea.vmem [#allocation5], %s1175_s28  ;;  %s1189_s9 = scalar_lea.sflag [#allocation6], %s195_s24 }
  0x10   : > { %s1452_s6 = scalar_select %p1182_p6, 1, 0 }
  0x11   : > { %s206_s8 = sshll.u32 %s199_s7, 4  ;;  %s917_s10 = scalar_lea.hbm %s1180_s5, 4096  ;;  %s1187_s8 = int_to_ptr.vmem [resolvable:$true] %s206_s8 }
  0x12   : > { %p918_p7 = scmp.ne.s32.totalorder %s1180_s5, %s917_s10  ;;  %p1447_p8 = pneg %p1182_p6 }
  0x13   : > { %s922_s13 = scalar_lea.hbm %s1442_s1, 8192  ;;  %p923_p11 = scmp.lt.u32.totalorder %s1180_s5, %s1442_s1 }
  0x14   : > { %p920_p9 = pnand %p1447_p8, %p918_p7  ;;  %p924_p12 = scmp.lt.u32.totalorder %s922_s13, %s917_s10 }
  0x15   : > { %p926_p0 = scmp.lt.u32.totalorder %s917_s10, %s1180_s5 }
  0x16   : > { %p921_p10 = pneg %p920_p9  ;;  %p925_p13 = por %p924_p12, %p923_p11 }
  0x18   : > { %p927_p1 = por %p926_p0, %p925_p13 }
  0x1a   : > { %p928_p2 = pnand %p927_p1, %p921_p10 }
  0x1c   : > { %931 = shalt.err (!%p928_p2)
}
  0x1d   : > { %s932_s23 = scalar_lea.vmem %s1187_s8, 4096  ;;  %s1091_s24 = smov [#allocation5]  }
  0x1e   : > { %p933_p3 = scmp.ne.s32.totalorder %s1187_s8, %s932_s23  ;;  %s937_s25 = sshll.u32 %s1091_s24, 4  ;;  %s938_s25 = int_to_ptr.vmem [resolvable:$false] %s937_s25 }
  0x1f   : > { %s939_s26 = scalar_lea.vmem %s938_s25, 8192  ;;  %p940_p7 = scmp.lt.s32.totalorder %s1187_s8, %s938_s25 }
  0x20   : > { %p935_p4 = pnand %p933_p3, %p1447_p8  ;;  %p941_p9 = scmp.lt.s32.totalorder %s939_s26, %s932_s23 }
  0x22   : > { %p936_p5 = pneg %p935_p4  ;;  %p942_p11 = por %p941_p9, %p940_p7 }
  0x24   : > { %p943_p12 = pnand %p942_p11, %p936_p5 }
  0x26   : > { %946 = shalt.err (!%p943_p12)
}
  0x27   : > { %s1092_s29 = smov 512   ;;  %s1093_s30 = smov 256  }
  0x28   : > { %s1094_s7 = smov 16   ;;  %s1218_s10 = sadd.s32 4294967295, %s1089_s20  }
  0x29   : > { %841 = dma.hbm_to_vmem [thread:$0]  (!%p1182_p6), %s1180_s5, 4096, %s1187_s8, %s1189_s9, %s1092_s29, %s1093_s30, %s1094_s7  }
  0x2a   : > { %p77_p10 = scmp.ne.s32.totalorder %s1073_s16, %s1069_s15  ;;  %p1446_p13 = scmp.eq.s32.totalorder %s1218_s10, 0 }
  0x2b   : > { %p699_p0 = scmp.ge.s32.totalorder %s1089_s20, 1  ;;  %p166_p1 = scmp.lt.s32.totalorder %s1089_s20, 3 }
  0x2c   : > { %p1227_p2 = por %p1446_p13, %p77_p10  ;;  %s1095_s5 = smov [#allocation2]  }
  0x2d   : > { %p1231_p3 = pnand %p699_p0, %p166_p1  ;;  %s181_s8 = sshll.u32 %s1095_s5, 4  ;;  %s1235_s8 = int_to_ptr.vmem [resolvable:$true] %s181_s8 }
  0x2e   : > { %s1453_s11 = scalar_select %p1227_p2, 1, 0 }
  0x2f   : > { %s1454_s12 = scalar_select %p1231_p3, 1, 0 }
  0x30   : > { %p834_p4 = pneg %p1231_p3  ;;  %s719_s15 = sshll.u32 %s1085_s19, 12 }
  0x31   : > { %s1249_s23 = scalar_lea.hbm %s1444_s3, %s719_s15  ;;  %s228_s24 = scalar_lea.vmem [#allocation7], %s1175_s28 }
  0x32   : > { %p1242_p5 = pnand %p834_p4, %p1446_p13  ;;  %s235_s25 = sshll.u32 %s228_s24, 4  ;;  %s1252_s25 = int_to_ptr.vmem [resolvable:$true] %s235_s25 }
  0x33   : > { %s947_s30 = scalar_lea.hbm %s1441_s0, 256 }
  0x34   : > { %p948_p7 = scmp.ne.s32.totalorder %s1441_s0, %s947_s30  ;;  %p949_p9 = pneg %p1242_p5 }
  0x35   : > { %p954_p10 = scmp.lt.u32.totalorder %s947_s30, %s1441_s0 }
  0x36   : > { %p950_p11 = pnand %p949_p9, %p948_p7 }
  0x38   : > { %p951_p12 = pneg %p950_p11 }
  0x3a   : > { %p956_p0 = pnand %p954_p10, %p951_p12 }
  0x3c   : > { %959 = shalt.err (!%p956_p0)
}
  0x3d   : > { %s960_s28 = scalar_lea.vmem %s1235_s8, 256  ;;  %p968_p8 = scmp.lt.s32.totalorder %s1235_s8, %s1235_s8 }
  0x3e   : > { %p961_p1 = scmp.ne.s32.totalorder %s1235_s8, %s960_s28  ;;  %p969_p2 = scmp.lt.s32.totalorder %s960_s28, %s960_s28 }
  0x40   : > { %p963_p4 = pnand %p961_p1, %p949_p9  ;;  %p970_p3 = por %p969_p2, %p968_p8 }
  0x42   : > { %p964_p13 = pneg %p963_p4 }
  0x44   : > { %p971_p6 = pnand %p970_p3, %p964_p13 }
  0x46   : > { %974 = shalt.err (!%p971_p6)
}
  0x47   : > { %s1096_s15 = smov 128   ;;  %s1097_s24 = smov 8  }
  0x48   : > { %837 = dma.hbm_to_vmem [thread:$0]  (!%p1242_p5), %s1441_s0, 256, %s1235_s8, [#allocation3], %s1096_s15, %s1096_s15, %s1097_s24  }
  0x49   : > { %s975_s30 = scalar_lea.hbm %s1249_s23, 4096  ;;  %p1456_p6 = scmp.ne.s32.totalorder %s1452_s6, 0 }
  0x4a   : > { %p976_p8 = scmp.ne.s32.totalorder %s1249_s23, %s975_s30  ;;  %s980_s14 = scalar_lea.hbm %s1444_s3, 8192 }
  0x4b   : > { %p1457_p13 = pneg %p1456_p6  ;;  %p981_p7 = scmp.lt.u32.totalorder %s1249_s23, %s1444_s3 }
  0x4c   : > { %p982_p9 = scmp.lt.u32.totalorder %s980_s14, %s975_s30  ;;  %p984_p12 = scmp.lt.u32.totalorder %s975_s30, %s1249_s23 }
  0x4d   : > { %p978_p2 = pnand %p976_p8, %p1457_p13 }
  0x4e   : > { %p983_p11 = por %p982_p9, %p981_p7 }
  0x4f   : > { %p979_p3 = pneg %p978_p2 }
  0x50   : > { %p985_p10 = por %p984_p12, %p983_p11 }
  0x52   : > { %p986_p0 = pnand %p985_p10, %p979_p3 }
  0x54   : > { %989 = shalt.err (!%p986_p0)
}
  0x55   : > { %s990_s8 = scalar_lea.vmem %s1252_s25, 4096  ;;  %p1458_p1 = pmov %p1457_p13 }
  0x56   : > { %p991_p5 = scmp.ne.s32.totalorder %s1252_s25, %s990_s8  ;;  %s1098_s13 = smov [#allocation7]  }
  0x57   : > { %s995_s26 = sshll.u32 %s1098_s13, 4  ;;  %s996_s26 = int_to_ptr.vmem [resolvable:$false] %s995_s26 }
  0x58   : > { %p993_p4 = pnand %p991_p5, %p1458_p1  ;;  %s997_s29 = scalar_lea.vmem %s996_s26, 8192 }
  0x59   : > { %p998_p13 = scmp.lt.s32.totalorder %s1252_s25, %s996_s26  ;;  %p999_p2 = scmp.lt.s32.totalorder %s997_s29, %s990_s8 }
  0x5a   : > { %p994_p8 = pneg %p993_p4 }
  0x5b   : > { %p1000_p7 = por %p999_p2, %p998_p13 }
  0x5d   : > { %p1001_p9 = pnand %p1000_p7, %p994_p8 }
  0x5f   : > { %1004 = shalt.err (!%p1001_p9)
}
  0x60   : > { %844 = dma.hbm_to_vmem [thread:$0]  (!%p1456_p6), %s1249_s23, 4096, %s1252_s25, %s1189_s9, %s1096_s15, %s1096_s15, %s1097_s24  }
  0x61   : > { %p1459_p3 = scmp.ne.s32.totalorder %s1454_s12, 0 }
  0x62   : > { %p1460_p11 = scmp.eq.s32.totalorder (!%p1459_p3), %s1218_s10, 0 }
  0x63   : > { %247 = sbr.rel (%p1459_p3) target bundleno = 633 (0x279), region = 36 }
  0x6a   : > { %1056 = dma.done.wait (%p1460_p11), [#allocation3], 256   ;;  %p1461_p12 = pmov %p1460_p11 }
  0x6b   : > { %s253_s6 = sand.u32 1, %s1218_s10   ;;  %s255_s30 = sand.u32 1, %s1073_s16  }
  0x6c   : > { %1058 = vsyncadd (%p1461_p12), [#allocation3], 4294967040  ;;  %s710_s7 = sshll.u32 %s255_s30, 8  ;;  %s254_s5 = scalar_lea.sflag [#allocation6], %s253_s6 }
  0x6d   : > { %s1313_s14 = scalar_lea.vmem [#allocation5], %s710_s7  ;;  %p1462_p10 = scmp.ne.s32.totalorder %s1453_s11, 0 }
  0x6f   : > { %1060 = dma.done.wait (%p1462_p10), %s254_s5, 8192  }
  0x70   : > { %1062 = vsyncadd (%p1462_p10), %s254_s5, 4294959104  ;;  %s712_s9 = sshll.u32 %s1081_s18, 1  ;;  %s1326_s15 = scalar_lea.vmem [#allocation7], %s710_s7 }
  0x71   : > { %p298_p6 = scmp.lt.s32.totalorder %s712_s9, 3  ;;  %p713_p0 = scmp.ne.s32.totalorder %s1081_s18, 0 }
  0x72   : > { %v1099_v0 = vmov (!%p713_p0), 0.0  }
  0x73   : > { %s1471_s9 = smov (!%p298_p6, %s712_s9), 3  ;;  %307 = sbr.rel (%p713_p0) target bundleno = 122 (0x7a), region = 52 }
  0x74   : > { %s300_s25 = scalar_lea.vmem %s1443_s2, %s1471_s9  ;;  %308 = vst [vmem:[#allocation8] sm:$0xff] (!%p713_p0), %v1099_v0  ;;  %309 = vst [vmem:[#allocation8 + $0x8] sm:$0xff] (!%p713_p0), %v1099_v0 }
  0x7a PF: > { %v313_v1 = vld [vmem:[%s1313_s14 + $0x8] sm:$0xff]  ;;  %v315_v2 = vld [vmem:[%s1313_s14 + $0x18] sm:$0xff]  ;;  %v312_v3 = vld [vmem:[%s1313_s14] sm:$0xff]  ;;  %v1100_v8 = vmov 0.0   ;;  %s1101_s24 = smov [#allocation8]   ;;  %p848_p5 = scmp.eq.s32.totalorder %s1218_s10, 1 }
  0x7b   : > { %v758_v4 = vpack.c.bf16 %v315_v2, %v313_v1  ;;  %v314_v5 = vld [vmem:[%s1313_s14 + $0x10] sm:$0xff]  ;;  %v317_v6 = vld [vmem:[%s1313_s14 + $0x28] sm:$0xff]  ;;  %v319_v7 = vld [vmem:[%s1313_s14 + $0x38] sm:$0xff]  ;;  %420 = vmatprep.mubr.f32.mxu0 %v1100_v8  ;;  %s591_s22 = sshll.u32 %s1101_s24, 4  ;;  %s592_s22 = int_to_ptr.vmem [resolvable:$true] %s591_s22 }
  0x7c   : > { %v760_v9 = vpack.c.bf16 %v314_v5, %v312_v3  ;;  %v762_v10 = vpack.c.bf16 %v319_v7, %v317_v6  ;;  %v316_v11 = vld [vmem:[%s1313_s14 + $0x20] sm:$0xff]  ;;  %v318_v12 = vld [vmem:[%s1313_s14 + $0x30] sm:$0xff]  ;;  %v321_v13 = vld [vmem:[%s1313_s14 + $0x48] sm:$0xff]  ;;  %s1005_s28 = scalar_lea.vmem %s592_s22, 256  ;;  %p1012_p13 = scmp.lt.s32.totalorder %s592_s22, %s592_s22 }
  0x7d   : > { %759 = vmatprep.subr.bf16.mxu0 %v758_v4  ;;  %v323_v14 = vld [vmem:[%s1313_s14 + $0x58] sm:$0xff]  ;;  %v764_v15 = vpack.c.bf16 %v318_v12, %v316_v11  ;;  %v320_v17 = vld [vmem:[%s1313_s14 + $0x40] sm:$0xff]  ;;  %v322_v18 = vld [vmem:[%s1313_s14 + $0x50] sm:$0xff]  ;;  %p1006_p1 = scmp.ne.s32.totalorder %s592_s22, %s1005_s28  ;;  %p1013_p2 = scmp.lt.s32.totalorder %s1005_s28, %s1005_s28 }
  0x7e   : > { %761 = vmatpush1.bf16.msra.mxu0 %v760_v9  ;;  %v766_v16 = vpack.c.bf16 %v323_v14, %v321_v13  ;;  %v325_v19 = vld [vmem:[%s1313_s14 + $0x68] sm:$0xff]  ;;  %v327_v20 = vld [vmem:[%s1313_s14 + $0x78] sm:$0xff]  ;;  %v768_v21 = vpack.c.bf16 %v322_v18, %v320_v17  ;;  %v324_v23 = vld [vmem:[%s1313_s14 + $0x60] sm:$0xff] }
  0x7f   : > { %763 = vmatprep.subr.bf16.mxu0 %v762_v10  ;;  %v770_v22 = vpack.c.bf16 %v327_v20, %v325_v19  ;;  %v326_v24 = vld [vmem:[%s1313_s14 + $0x70] sm:$0xff]  ;;  %v329_v25 = vld [vmem:[%s1313_s14 + $0x88] sm:$0xff]  ;;  %v331_v26 = vld [vmem:[%s1313_s14 + $0x98] sm:$0xff]  ;;  %p1007_p4 = pnand %p1006_p1, %p848_p5  ;;  %p1014_p7 = por %p1013_p2, %p1012_p13 }
  0x80   : > { %v487_v27 = vld [vmem:[%s1326_s15 + $0x80] sm:$0xff]  ;;  %v488_v28 = vld [vmem:[%s1326_s15 + $0x88] sm:$0xff]  ;;  %v772_v29 = vpack.c.bf16 %v326_v24, %v324_v23  ;;  %v774_v33 = vpack.c.bf16 %v331_v26, %v329_v25  ;;  %v330_v35 = vld [vmem:[%s1313_s14 + $0x90] sm:$0xff] }
  0x81   : > { %v790_v30 = vpack.c.bf16 %v488_v28, %v487_v27  ;;  %v471_v31 = vld [vmem:[%s1326_s15] sm:$0xff]  ;;  %v472_v32 = vld [vmem:[%s1326_s15 + $0x8] sm:$0xff]  ;;  %v335_v38 = vld [vmem:[%s1313_s14 + $0xb8] sm:$0xff]  ;;  %p1008_p8 = pneg %p1007_p4 }
  0x82   : > { %765 = vmatpush1.bf16.msra.mxu0 %v764_v15  ;;  %v328_v34 = vld [vmem:[%s1313_s14 + $0x80] sm:$0xff]  ;;  %v792_v36 = vpack.c.bf16 %v472_v32, %v471_v31  ;;  %v333_v37 = vld [vmem:[%s1313_s14 + $0xa8] sm:$0xff]  ;;  %v334_v42 = vld [vmem:[%s1313_s14 + $0xb0] sm:$0xff] }
  0x83   : > { %767 = vmatprep.subr.bf16.mxu0 %v766_v16  ;;  %791 = vmatprep.subr.bf16.mxu1 %v790_v30  ;;  %v776_v39 = vpack.c.bf16 %v330_v35, %v328_v34  ;;  %v778_v40 = vpack.c.bf16 %v335_v38, %v333_v37  ;;  %v332_v41 = vld [vmem:[%s1313_s14 + $0xa0] sm:$0xff]  ;;  %v337_v43 = vld [vmem:[%s1313_s14 + $0xc8] sm:$0xff]  ;;  %v339_v44 = vld [vmem:[%s1313_s14 + $0xd8] sm:$0xff]  ;;  %p1015_p9 = pnand %p1014_p7, %p1008_p8 }
  0x84   : > { %793 = vmatpush3.bf16.msra.mxu1 %v792_v36  ;;  %v780_v45 = vpack.c.bf16 %v334_v42, %v332_v41  ;;  %v782_v46 = vpack.c.bf16 %v339_v44, %v337_v43  ;;  %v336_v47 = vld [vmem:[%s1313_s14 + $0xc0] sm:$0xff]  ;;  %v338_v48 = vld [vmem:[%s1313_s14 + $0xd0] sm:$0xff]  ;;  %v341_v49 = vld [vmem:[%s1313_s14 + $0xe8] sm:$0xff]  ;;  %v346_v36 = vlaneseq }
  0x85   : > { %v343_v50 = vld [vmem:[%s1313_s14 + $0xf8] sm:$0xff]  ;;  %v784_v51 = vpack.c.bf16 %v338_v48, %v336_v47  ;;  %v340_v53 = vld [vmem:[%s1313_s14 + $0xe0] sm:$0xff]  ;;  %v342_v54 = vld [vmem:[%s1313_s14 + $0xf0] sm:$0xff] }
  0x86   : > { %769 = vmatpush1.bf16.msra.mxu0 %v768_v21  ;;  %v786_v52 = vpack.c.bf16 %v343_v50, %v341_v49  ;;  %v788_v55 = vpack.c.bf16 %v342_v54, %v340_v53  ;;  %v310_v56 = vld [vmem:[#allocation2] sm:$0xff]  ;;  %v311_v57 = vld [vmem:[#allocation2 + $0x8] sm:$0xff]  ;;  %v491_v0 = vld [vmem:[%s1326_s15 + $0xa0] sm:$0xff]  ;;  %v347_v37 = vshrl.u32 %v346_v36, 7 }
  0x87   : > { %771 = vmatprep.subr.bf16.mxu0 %v770_v22  ;;  %v489_v58 = vld [vmem:[%s1326_s15 + $0x90] sm:$0xff]  ;;  %v490_v59 = vld [vmem:[%s1326_s15 + $0x98] sm:$0xff]  ;;  %v492_v1 = vld [vmem:[%s1326_s15 + $0xa8] sm:$0xff] }
  0x88   : > { %v794_v60 = vpack.c.bf16 %v490_v59, %v489_v58  ;;  %v473_v61 = vld [vmem:[%s1326_s15 + $0x10] sm:$0xff]  ;;  %v474_v62 = vld [vmem:[%s1326_s15 + $0x18] sm:$0xff]  ;;  %v798_v2 = vpack.c.bf16 %v492_v1, %v491_v0  ;;  %v475_v3 = vld [vmem:[%s1326_s15 + $0x20] sm:$0xff]  ;;  %v348_v38 = vsub.s32 0, %v347_v37 }
  0x89   : > { %v796_v63 = vpack.c.bf16 %v474_v62, %v473_v61  ;;  %v476_v4 = vld [vmem:[%s1326_s15 + $0x28] sm:$0xff]  ;;  %v493_v6 = vld [vmem:[%s1326_s15 + $0xb0] sm:$0xff]  ;;  %v494_v7 = vld [vmem:[%s1326_s15 + $0xb8] sm:$0xff] }
  0x8a   : > { %773 = vmatpush1.bf16.msra.mxu0 %v772_v29  ;;  %795 = vmatprep.subr.bf16.mxu1 %v794_v60  ;;  %v800_v5 = vpack.c.bf16 %v476_v4, %v475_v3  ;;  %v477_v9 = vld [vmem:[%s1326_s15 + $0x30] sm:$0xff]  ;;  %v478_v10 = vld [vmem:[%s1326_s15 + $0x38] sm:$0xff]  ;;  %v495_v12 = vld [vmem:[%s1326_s15 + $0xc0] sm:$0xff] }
  0x8b   : > { %775 = vmatprep.subr.bf16.mxu0 %v774_v33  ;;  %797 = vmatpush3.bf16.msra.mxu1 %v796_v63  ;;  %v804_v11 = vpack.c.bf16 %v478_v10, %v477_v9  ;;  %v496_v13 = vld [vmem:[%s1326_s15 + $0xc8] sm:$0xff]  ;;  %v479_v15 = vld [vmem:[%s1326_s15 + $0x40] sm:$0xff]  ;;  %v497_v18 = vld [vmem:[%s1326_s15 + $0xd0] sm:$0xff] }
  0x8c   : > { %799 = vmatprep.subr.bf16.mxu1 %v798_v2  ;;  %v806_v14 = vpack.c.bf16 %v496_v13, %v495_v12  ;;  %v480_v16 = vld [vmem:[%s1326_s15 + $0x48] sm:$0xff]  ;;  %v498_v19 = vld [vmem:[%s1326_s15 + $0xd8] sm:$0xff]  ;;  %v481_v20 = vld [vmem:[%s1326_s15 + $0x50] sm:$0xff] }
  0x8d   : > { %v808_v17 = vpack.c.bf16 %v480_v16, %v479_v15  ;;  %v810_v21 = vpack.c.bf16 %v498_v19, %v497_v18  ;;  %v482_v22 = vld [vmem:[%s1326_s15 + $0x58] sm:$0xff]  ;;  %v499_v23 = vld [vmem:[%s1326_s15 + $0xe0] sm:$0xff]  ;;  %v500_v24 = vld [vmem:[%s1326_s15 + $0xe8] sm:$0xff] }
  0x8e   : > { %777 = vmatpush1.bf16.msra.mxu0 %v776_v39  ;;  %v812_v25 = vpack.c.bf16 %v482_v22, %v481_v20  ;;  %v814_v26 = vpack.c.bf16 %v500_v24, %v499_v23  ;;  %v483_v27 = vld [vmem:[%s1326_s15 + $0x60] sm:$0xff]  ;;  %v484_v28 = vld [vmem:[%s1326_s15 + $0x68] sm:$0xff]  ;;  %v501_v29 = vld [vmem:[%s1326_s15 + $0xf0] sm:$0xff] }
  0x8f   : > { %779 = vmatprep.subr.bf16.mxu0 %v778_v40  ;;  %801 = vmatpush3.bf16.msra.mxu1 %v800_v5  ;;  %v502_v30 = vld [vmem:[%s1326_s15 + $0xf8] sm:$0xff]  ;;  %v816_v31 = vpack.c.bf16 %v484_v28, %v483_v27  ;;  %v485_v33 = vld [vmem:[%s1326_s15 + $0x70] sm:$0xff]  ;;  %v352_v40 = vsub.s32 1, %v347_v37  ;;  %v469_v24 = vld [vmem:[#allocation8] sm:$0xff] }
  0x90   : > { %v818_v32 = vpack.c.bf16 %v502_v30, %v501_v29  ;;  %v486_v34 = vld [vmem:[%s1326_s15 + $0x78] sm:$0xff]  ;;  %v344_v39 = vld [vmem:[%s300_s25] sm:$0x3]  ;;  %v470_v29 = vld [vmem:[#allocation8 + $0x8] sm:$0xff] }
  0x91   : > { %v820_v35 = vpack.c.bf16 %v486_v34, %v485_v33  ;;  %v349_v41 = vrot.slane %v344_v39, %v348_v38  ;;  %v353_v42 = vrot.slane %v344_v39, %v352_v40 }
  0x92   : > { %781 = vmatpush1.bf16.msra.mxu0 %v780_v45 }
  0x93   : > { %783 = vmatprep.subr.bf16.mxu0 %v782_v46 }
  0x96   : > { %785 = vmatpush1.bf16.msra.mxu0 %v784_v51 }
  0x97   : > { %787 = vmatprep.subr.bf16.mxu0 %v786_v52 }
  0x9a   : > { %789 = vmatpush1.bf16.msra.mxu0 %v788_v55 }
  0x9d   : > { %421 = vmatmul.mubr.f32.vlgmr.msra.gmra.mrb[0].mxu0 %v310_v56 }
  0x9e   : > { %426 = vmatprep.mubr.f32.mxu0 %v1100_v8  ;;  %v802_v8 = vpack.c.bf16 %v494_v7, %v493_v6 }
  0xa0   : > { %803 = vmatprep.subr.bf16.mxu1 %v802_v8 }
  0xa1   : > { %427 = vmatmul.mubr.f32.gmra.mrb[2].mxu0 %v311_v57  ;;  %805 = vmatpush3.bf16.msra.mxu1 %v804_v11 }
  0xa2   : > { %807 = vmatprep.subr.bf16.mxu1 %v806_v14 }
  0xa5   : > { %809 = vmatpush3.bf16.msra.mxu1 %v808_v17 }
  0xa6   : > { %811 = vmatprep.subr.bf16.mxu1 %v810_v21 }
  0xa9   : > { %813 = vmatpush3.bf16.msra.mxu1 %v812_v25 }
  0xaa   : > { %815 = vmatprep.subr.bf16.mxu1 %v814_v26 }
  0xad   : > { %817 = vmatpush3.bf16.msra.mxu1 %v816_v31 }
  0xae   : > { %819 = vmatprep.subr.bf16.mxu1 %v818_v32 }
  0xb1   : > { %821 = vmatpush3.bf16.msra.mxu1 %v820_v35 }
 0x170   : > { %v422_v43 = vpop.f32.mrb[0].mxu0 }
 0x171   : > { %v423_v44 = vadd.f32 %v422_v43, %v349_v41  ;;  %v424_v45 = vpop.f32.mrb[1].mxu0 }
 0x172   : > { %v425_v46 = vadd.f32 %v424_v45, %v353_v42 }
 0x173   : > { %v441_v47 = vmul.f32 0.044715, %v423_v44  ;;  %v437_v55 = vmul.f32 0.7978846, %v423_v44  ;;  %v433_v12 = vmul.f32 0.5, %v423_v44 }
 0x174   : > { %v442_v48 = vmul.f32 0.044715, %v425_v46  ;;  %v428_v49 = vpop.f32.mrb[2].mxu0  ;;  %v438_v59 = vmul.f32 0.7978846, %v425_v46  ;;  %v434_v10 = vmul.f32 0.5, %v425_v46 }
 0x175   : > { %v445_v50 = vmul.f32 %v441_v47, %v423_v44  ;;  %v429_v51 = vadd.f32 %v428_v49, %v349_v41  ;;  %v430_v52 = vpop.f32.mrb[3].mxu0 }
 0x176   : > { %v431_v53 = vadd.f32 %v430_v52, %v353_v42  ;;  %v446_v54 = vmul.f32 %v442_v48, %v425_v46 }
 0x177   : > { %v449_v56 = vadd.f32 1.0, %v445_v50  ;;  %v443_v57 = vmul.f32 0.044715, %v429_v51  ;;  %v439_v1 = vmul.f32 0.7978846, %v429_v51  ;;  %v435_v20 = vmul.f32 0.5, %v429_v51 }
 0x178   : > { %v444_v58 = vmul.f32 0.044715, %v431_v53  ;;  %v450_v60 = vadd.f32 1.0, %v446_v54  ;;  %v440_v3 = vmul.f32 0.7978846, %v431_v53  ;;  %v436_v18 = vmul.f32 0.5, %v431_v53 }
 0x179   : > { %v447_v61 = vmul.f32 %v443_v57, %v429_v51  ;;  %v453_v62 = vmul.f32 %v449_v56, %v437_v55 }
 0x17a   : > { %v448_v63 = vmul.f32 %v444_v58, %v431_v53  ;;  %v454_v0 = vmul.f32 %v450_v60, %v438_v59 }
 0x17b   : > { %v451_v2 = vadd.f32 1.0, %v447_v61  ;;  %909 = vtanh.f32 %v453_v62 }
 0x17c   : > { %v452_v4 = vadd.f32 1.0, %v448_v63  ;;  %911 = vtanh.f32 %v454_v0 }
 0x17d   : > { %v455_v5 = vmul.f32 %v451_v2, %v439_v1 }
 0x17e   : > { %v456_v6 = vmul.f32 %v452_v4, %v440_v3 }
 0x17f   : > { %913 = vtanh.f32 %v455_v5 }
 0x180   : > { %915 = vtanh.f32 %v456_v6 }
 0x185   : > { %v910_v7 = vpop.eup %909 }
 0x186   : > { %v912_v8 = vpop.eup %911  ;;  %v461_v9 = vadd.f32 1.0, %v910_v7 }
 0x187   : > { %v462_v11 = vadd.f32 1.0, %v912_v8 }
 0x188   : > { %v465_v16 = vmul.f32 %v461_v9, %v433_v12 }
 0x189   : > { %v914_v13 = vpop.eup %913  ;;  %v466_v14 = vmul.f32 %v462_v11, %v434_v10 }
 0x18a   : > { %v916_v15 = vpop.eup %915  ;;  %v463_v17 = vadd.f32 1.0, %v914_v13 }
 0x18b   : > { %567 = vmatprep.mubr.f32.mxu1 %v466_v14  ;;  %v464_v19 = vadd.f32 1.0, %v916_v15 }
 0x18c   : > { %568 = vmatmul.mubr.f32.vlgmr.msra.gmra.mrb[0].mxu1 %v465_v16  ;;  %v467_v22 = vmul.f32 %v463_v17, %v435_v20 }
 0x18d   : > { %v468_v21 = vmul.f32 %v464_v19, %v436_v18 }
 0x18f   : > { %572 = vmatprep.mubr.f32.mxu1 %v468_v21 }
 0x190   : > { %573 = vmatmul.mubr.f32.gmra.mrb[2].mxu1 %v467_v22 }
 0x25f   : > { %v752_v23 = vpop.f32.mrb[0].mxu1 }
 0x260   : > { %v753_v25 = vpop.f32.mrb[1].mxu1 }
 0x261   : > { %v754_v26 = vadd.f32 %v753_v25, %v752_v23 }
 0x263   : > { %v578_v27 = vadd.f32 %v754_v26, %v469_v24  ;;  %v755_v28 = vpop.f32.mrb[2].mxu1 }
 0x264   : > { %v756_v30 = vpop.f32.mrb[3].mxu1 }
 0x265   : > { %580 = vst [vmem:[#allocation8] sm:$0xff] %v578_v27  ;;  %v757_v31 = vadd.f32 %v756_v30, %v755_v28 }
 0x267   : > { %v579_v32 = vadd.f32 %v757_v31, %v470_v29 }
 0x269   : > { %581 = vst [vmem:[#allocation8 + $0x8] sm:$0xff] %v579_v32 }
 0x26a   : > { %1018 = shalt.err (!%p1015_p9)
}
 0x26b   : > { %s1019_s26 = scalar_lea.hbm %s1445_s4, 256 }
 0x26c   : > { %p1020_p3 = scmp.ne.s32.totalorder %s1445_s4, %s1019_s26  ;;  %p1025_p10 = scmp.lt.u32.totalorder %s1019_s26, %s1445_s4 }
 0x26e   : > { %p1021_p11 = pnand %p1020_p3, %p848_p5 }
 0x270   : > { %p1022_p12 = pneg %p1021_p11 }
 0x272   : > { %p1027_p6 = pnand %p1025_p10, %p1022_p12 }
 0x274   : > { %1030 = shalt.err (!%p1027_p6)
}
 0x275   : > { %s1102_s5 = smov 128   ;;  %s1103_s14 = smov 8  }
 0x276   : > { %831 = dma.vmem_to_hbm [thread:$0]  (%p848_p5), %s592_s22, 256, %s1445_s4, [#allocation4], %s1102_s5, %s1102_s5, %s1103_s14  }
 0x277   : > { %1064 = dma.done.wait (%p848_p5), [#allocation4], 256  }
 0x278   : > { %1066 = vsyncadd (%p848_p5), [#allocation4], 4294967040 }
 0x279 PF: > { %s19_s20 = sadd.s32 1, %s1089_s20   ;;  %s1463_s15 = smov %s1073_s16 }
 0x27a   : > { %p16_p0 = scmp.ge.s32.totalorder %s19_s20, 4   ;;  %s1464_s16 = smov %s1077_s17 }
 0x27b   : > { %s1465_s17 = smov %s1173_s27  ;;  %s1466_s18 = smov %s1085_s19 }
 0x27c   : > { %s1467_s19 = smov %s1469_s21  ;;  %18 = sbr.rel (!%p16_p0) target bundleno = 6 (0x6), region = 98 }
 0x283   :  { %607 = vsyncpa [#allocation3], 1 }
 0x284   :  { %609 = vsyncpa [#allocation3 + $0x1], 1 }
 0x285   :  { %610 = vsyncpa [#allocation6], 1 }
 0x286   :  { %612 = vsyncpa [#allocation6 + $0x1], 1 }
 0x287   :  { %613 = vsyncpa [#allocation4], 1 }
 0x288   :  { %615 = vsyncpa [#allocation4 + $0x1], 1 }

</bundles_post_ra>
